<compile_context>
chip_gen: v5e
topology: v5e:2x2
jax: 0.10.0
libtpu: 0.0.40
codegen_flags: <defaults>
</compile_context>

<pallas_src>
import jax
import jax.numpy as jnp
import numpy as np
from jax import lax
from jax.experimental import pallas as pl
from jax.experimental.pallas import tpu as pltpu


# ---------------------------------------------------------------------------
# Hardware-aware tiling helpers
# ---------------------------------------------------------------------------
def _round_up(x, m):
    return ((x + m - 1) // m) * m


def _cdiv(a, b):
    return -(-a // b)


def _vmem_capacity_bytes():
    try:
        info = pltpu.get_tpu_info()
        cap = getattr(info, "vmem_capacity_bytes", None)
        if cap:
            return int(cap)
    except Exception:
        pass
    return 64 * 1024 * 1024  # conservative default (v7x per-TC VMEM)


_STREAM_BUFFERS = 3          # input pipeline depth for long streams (sweep 2 vs 3)
_MAX_ROWS_TILE = 1024        # 512-1024 rows of 128 lanes already hit ~85% of HBM roofline
_STREAM_BUDGET = 16 << 20    # VMEM bytes reserved for streaming buffers (fits all gens)


def _choose_tiling(R, in_bytes, neg_bytes):
    """Pick a rows-of-128-lanes tile.  Returns (rows_tile, k_steps).

    rows_tile is a multiple of 8 (or equals R when a single block covers the
    whole row axis, which is always legal).  A ragged last block (when
    rows_tile does not divide R) is masked inside the kernel, so no padding of
    the inputs is required.
    """
    per_row = 128 * (3 * in_bytes * _STREAM_BUFFERS + neg_bytes * 2)
    max_rows = max(8, min((_STREAM_BUDGET // per_row) // 8 * 8, _MAX_ROWS_TILE))
    if R <= max_rows:
        return R, 1                       # single block == full rows dim
    k_steps = _cdiv(R, max_rows)
    rows_tile = min(_round_up(_cdiv(R, k_steps), 8), max_rows)
    return rows_tile, _cdiv(R, rows_tile)


# ---------------------------------------------------------------------------
# Pallas kernel: elementwise hot path + per-batch reductions.
#   grid = (B [parallel], K [arbitrary]); streamed blocks are (rows_tile, 128).
#   outputs per batch b:
#     neg_ref : (rows_tile, 128)  false-positive masked squared error (for top-k)
#     pos_ref : (1, 128)          resident accumulator of weight * mse * pos_mask
#     mse_ref : (1, 128)          resident accumulator of mse
# ---------------------------------------------------------------------------
def _make_kernel(rows_tile, total_rows, ragged):
    def kernel(y_ref, o_ref, w_ref, neg_ref, pos_ref, mse_ref):
        k = pl.program_id(1)

        @pl.when(k == 0)
        def _init():
            pos_ref[...] = jnp.zeros_like(pos_ref)
            mse_ref[...] = jnp.zeros_like(mse_ref)

        # Inputs stay in their native dtype in HBM; cast to f32 after the load.
        y = y_ref[...].astype(jnp.float32)
        o = o_ref[...].astype(jnp.float32)
        w = w_ref[...].astype(jnp.float32)

        diff = o - y
        mse = diff * diff
        pos_m = w > 0
        # (out > 0) > (weight > 0)  <=>  (out > 0) AND NOT (weight > 0)
        neg = jnp.where(jnp.logical_and(o > 0, jnp.logical_not(pos_m)), mse, 0.0)
        neg_ref[...] = neg.astype(neg_ref.dtype)

        pos_c = jnp.where(pos_m, w * mse, 0.0)
        mse_c = mse
        if ragged:
            # The last grid step's block extends past the real rows; those rows
            # are garbage reads.  Keep them (and any NaNs they produce) out of
            # the accumulators.  The corresponding neg writes are dropped by
            # Pallas's out-of-bounds store masking.
            row = lax.broadcasted_iota(jnp.int32, (rows_tile, 128), 0)
            valid = (row + k * rows_tile) < total_rows
            pos_c = jnp.where(valid, pos_c, 0.0)
            mse_c = jnp.where(valid, mse_c, 0.0)

        # Per-step in-register reduction into tiny resident accumulators:
        # one vreg load + one vreg store per step instead of full-width scratch.
        pos_ref[...] += jnp.sum(pos_c, axis=0, keepdims=True)
        mse_ref[...] += jnp.sum(mse_c, axis=0, keepdims=True)

    return kernel


def _stream_spec(rows_tile, k_steps):
    index_map = lambda b, k: (b, k, 0)
    # Deeper input pipelining only pays off on long streams.
    if k_steps >= 4 and _STREAM_BUFFERS != 2 and hasattr(pl, "Buffered"):
        try:
            return pl.BlockSpec((None, rows_tile, 128), index_map,
                                pipeline_mode=pl.Buffered(_STREAM_BUFFERS))
        except TypeError:   # older API without pipeline_mode
            pass
    return pl.BlockSpec((None, rows_tile, 128), index_map)


def swm_fpem_elementwise(y3, o3, w3, rows_tile, k_steps, neg_dtype):
    """y3/o3/w3: (B, R, 128).  Returns (neg_map, pos_partials, mse_partials)."""
    B, R, L = y3.shape
    assert L == 128
    ragged = rows_tile * k_steps != R

    in_bytes = max(y3.dtype.itemsize, o3.dtype.itemsize, w3.dtype.itemsize)
    neg_bytes = jnp.dtype(neg_dtype).itemsize

    # VMEM accounting: streamed input buffers + double-buffered neg output
    # + the resident (1,128) partial-sum blocks.
    tile_elems = rows_tile * 128
    buf_bytes = (3 * _STREAM_BUFFERS * tile_elems * in_bytes
                 + 2 * tile_elems * neg_bytes
                 + 4 * 128 * 4 * 2)
    cap = _vmem_capacity_bytes()
    vmem_limit = int(min(int(cap * 0.9), max(16 << 20, 2 * buf_bytes)))

    blk_in = _stream_spec(rows_tile, k_steps)
    blk_neg = pl.BlockSpec((None, rows_tile, 128), lambda b, k: (b, k, 0))
    blk_part = pl.BlockSpec((None, 1, 128), lambda b, k: (b, 0, 0))

    n_elems = B * R * 128
    cost = pl.CostEstimate(
        flops=8 * n_elems,
        transcendentals=0,
        bytes_accessed=n_elems * (3 * in_bytes + neg_bytes) + B * 2 * 128 * 4,
    )

    neg, pos_part, mse_part = pl.pallas_call(
        _make_kernel(rows_tile, R, ragged),
        out_shape=(
            jax.ShapeDtypeStruct((B, R, 128), neg_dtype),
            jax.ShapeDtypeStruct((B, 1, 128), jnp.float32),
            jax.ShapeDtypeStruct((B, 1, 128), jnp.float32),
        ),
        grid_spec=pltpu.PrefetchScalarGridSpec(
            num_scalar_prefetch=0,
            grid=(B, k_steps),
            in_specs=[blk_in, blk_in, blk_in],
            out_specs=(blk_neg, blk_part, blk_part),
        ),
        compiler_params=pltpu.CompilerParams(
            # B is parallel (independent per-batch outputs, shardable across
            # v7x's two TensorCores); the streaming/reduction axis is arbitrary.
            dimension_semantics=("parallel", "arbitrary"),
            vmem_limit_bytes=vmem_limit,
        ),
        cost_estimate=cost,
    )(y3, o3, w3)
    return neg, pos_part, mse_part


# ---------------------------------------------------------------------------
# Full SWM + FPEM loss (forward of the PyTorch module).
# ---------------------------------------------------------------------------
def swm_fpem_loss(y, out, weight, total_size, *, alpha, neg_pos_ratio,
                  max_total_size=None, neg_dtype=jnp.bfloat16,
                  input_dtype=None, rows_tile=None):
    """Forward of SWM_FPEM_Loss.

    max_total_size: static upper bound on every total_size[b]; enables bounded
      top-k (O(N log k)).  NOTE: if a runtime total_size exceeds it, the
      negative-sampling count is clamped to max_total_size * neg_pos_ratio.
    neg_dtype: storage dtype of the false-positive loss map fed to top-k
      (bf16 halves its HBM writeback + re-read; shifts the loss at ~1e-3 rel).
    input_dtype: optionally downcast y/out/weight (e.g. bf16) before the kernel;
      only a win if XLA fuses the cast into their producers.
    rows_tile: override the auto-chosen streaming tile (testing).
    """
    if y.ndim == 3:
        y = y[..., None]
        out = out.reshape(y.shape)
        weight = weight.reshape(y.shape)
    B, H, W, C = y.shape
    N = H * W * C

    yf = y.reshape(B, N)
    of = out.reshape(B, N)
    wf = weight.reshape(B, N)
    if input_dtype is not None:
        yf, of, wf = (a.astype(input_dtype) for a in (yf, of, wf))

    # Lane-dense view (B, R, 128).  No padding when N % 128 == 0 (common case);
    # otherwise pad by < 128 elements per batch.  Zero padding is inert:
    # mse = 0, not positive, not a false positive.
    R = _cdiv(N, 128)
    Np = R * 128
    if Np != N:
        pad = ((0, 0), (0, Np - N))
        yf, of, wf = jnp.pad(yf, pad), jnp.pad(of, pad), jnp.pad(wf, pad)
    y3, o3, w3 = (a.reshape(B, R, 128) for a in (yf, of, wf))

    in_bytes = max(y3.dtype.itemsize, o3.dtype.itemsize, w3.dtype.itemsize)
    neg_bytes = jnp.dtype(neg_dtype).itemsize
    if rows_tile is None:
        rows_tile, k_steps = _choose_tiling(R, in_bytes, neg_bytes)
    else:
        k_steps = _cdiv(R, rows_tile)

    neg3, pos_part, mse_part = swm_fpem_elementwise(
        y3, o3, w3, rows_tile, k_steps, neg_dtype)

    pos_sum = jnp.sum(pos_part, axis=(1, 2))           # (B,)
    mse_mean = jnp.sum(mse_part) / (B * N)             # masked/padded terms are 0

    ts = total_size[:, 0].astype(jnp.float32)           # squeeze(1)
    sampling = jnp.minimum(ts.astype(jnp.int32) * neg_pos_ratio, N)   # (B,)

    neg_flat = neg3.reshape(B, Np)
    if max_total_size is not None:
        # Bounded top-k: O(N log k) instead of a full O(N log N) sort.
        k_stat = int(min(max(int(max_total_size) * neg_pos_ratio, 1), N))
        top_vals = lax.top_k(neg_flat, k_stat)[0].astype(jnp.float32)
        sampling = jnp.minimum(sampling, k_stat)
    else:
        # TODO(synk): no static bound on total_size -> full descending sort;
        #             Pallas TPU has no sort/top-k primitive for an in-kernel
        #             candidate pre-reduction, so this re-reads the whole map.
        top_vals = jnp.sort(neg_flat[:, :N].astype(jnp.float32), axis=1)[:, ::-1]
    idx = jnp.arange(top_vals.shape[1])[None, :]
    topk_sum = jnp.sum(jnp.where(idx < sampling[:, None], top_vals, 0.0), axis=1)

    denom = jnp.where(ts > 0, ts, 1.0)
    per_b = (alpha * pos_sum + topk_sum) / denom
    train_loss = jnp.sum(jnp.where(ts > 0, per_b, 0.0)) / B
    return (train_loss + mse_mean) * 10.0
    # TODO(synk): v7x-only follow-up -- split the streaming axis into a second
    # "parallel" grid dim when B == 1 so the second TensorCore is not idle.


# ---------------------------------------------------------------------------
# Pure-JAX reference (mirrors the PyTorch forward) for verification.
# ---------------------------------------------------------------------------
def ref_loss(y, out, weight, total_size, alpha, neg_pos_ratio):
    if y.ndim == 3:
        y = y[..., None]
    B, H, W, C = y.shape
    N = H * W * C
    yf = y.reshape(B, N).astype(jnp.float32)
    of = out.reshape(B, N).astype(jnp.float32)
    wf = weight.reshape(B, N).astype(jnp.float32)
    ts = np.asarray(total_size)[:, 0]

    pos_idx = (wf > 0).astype(jnp.float32)
    neg_idx = jnp.logical_and(of > 0, jnp.logical_not(wf > 0)).astype(jnp.float32)
    mse = (of - yf) ** 2
    pos_loss = wf * mse * pos_idx
    neg_loss = mse * neg_idx

    train = 0.0
    for b in range(B):
        if ts[b] > 0:
            sampling = int(min(int(ts[b]) * neg_pos_ratio, N))
            nl = jnp.sum(jax.lax.top_k(neg_loss[b], sampling)[0]) if sampling > 0 else 0.0
            train += (alpha * jnp.sum(pos_loss[b]) + nl) / ts[b]
    train = train / B
    return (train + jnp.mean(mse)) * 10.0


if __name__ == "__main__":
    num_classes = 4
    alpha = 1.0
    neg_pos_ratio = 3

    def make_inputs(key, B, H, W, C):
        k1, k2, k3 = jax.random.split(key, 3)
        y = (jax.random.uniform(k1, (B, H, W, C)) > 0.7).astype(jnp.float32)
        out = jax.random.normal(k2, (B, H, W, C), dtype=jnp.float32)
        wraw = jax.random.uniform(k3, (B, H, W, C))
        weight = jnp.where(wraw > 0.8, wraw * 2.0, 0.0).astype(jnp.float32)
        return y, out, weight

    # Case 1: B=2, 16x16x4 (N=1024, single grid step), exact f32 neg map.
    y, out, weight = make_inputs(jax.random.PRNGKey(0), 2, 16, 16, num_classes)
    total_size = jnp.array([[5.0], [0.0]], dtype=jnp.float32)  # (B, 1)
    max_ts = int(np.asarray(total_size).max())
    loss = jax.block_until_ready(swm_fpem_loss(
        y, out, weight, total_size, alpha=alpha, neg_pos_ratio=neg_pos_ratio,
        max_total_size=max_ts, neg_dtype=jnp.float32))
    ref = jax.block_until_ready(
        ref_loss(y, out, weight, total_size, alpha, neg_pos_ratio))
    np.testing.assert_allclose(np.asarray(loss), np.asarray(ref),
                               rtol=1e-5, atol=1e-5)

    # Case 2: default bf16 false-positive map (halves its HBM round trip).
    loss_bf16 = jax.block_until_ready(swm_fpem_loss(
        y, out, weight, total_size, alpha=alpha, neg_pos_ratio=neg_pos_ratio,
        max_total_size=max_ts))
    np.testing.assert_allclose(np.asarray(loss_bf16), np.asarray(ref),
                               rtol=1e-2, atol=1e-3)

    # Case 3: 24x24x4 (N=2304, R=18) with forced rows_tile=8 -> multi-step grid
    # with a ragged, in-kernel-masked last block (no input padding).
    y3a, o3a, w3a = make_inputs(jax.random.PRNGKey(1), 2, 24, 24, num_classes)
    total_size3 = jnp.array([[7.0], [3.0]], dtype=jnp.float32)
    loss3 = jax.block_until_ready(swm_fpem_loss(
        y3a, o3a, w3a, total_size3, alpha=alpha, neg_pos_ratio=neg_pos_ratio,
        max_total_size=7, neg_dtype=jnp.float32, rows_tile=8))
    ref3 = jax.block_until_ready(
        ref_loss(y3a, o3a, w3a, total_size3, alpha, neg_pos_ratio))
    np.testing.assert_allclose(np.asarray(loss3), np.asarray(ref3),
                               rtol=1e-5, atol=1e-5)

    print("KERNEL_OK")
</pallas_src>

<mosaic_0001>
module attributes {stable_mosaic.version = 11 : i64} {
  func.func @kernel(%arg0: i32, %arg1: i32, %arg2: memref<1x8x128xf32, #tpu.memory_space<vmem>>, %arg3: memref<1x8x128xf32, #tpu.memory_space<vmem>>, %arg4: memref<1x8x128xf32, #tpu.memory_space<vmem>>, %arg5: memref<1x8x128xf32, #tpu.memory_space<vmem>>, %arg6: memref<1x1x128xf32, #tpu.memory_space<vmem>>, %arg7: memref<1x1x128xf32, #tpu.memory_space<vmem>>) attributes {dimension_semantics = [#tpu.dimension_semantics<parallel>, #tpu.dimension_semantics<arbitrary>], iteration_bounds = array<i64: 2, 1>, scalar_prefetch = 0 : i64, scratch_operands = 0 : i64, tpu.core_type = #tpu.core_type<tc>, window_params = [{transform_indices = @transform_0, window_bounds = array<i64: 1, 8, 128>}, {transform_indices = @transform_1, window_bounds = array<i64: 1, 8, 128>}, {transform_indices = @transform_2, window_bounds = array<i64: 1, 8, 128>}, {transform_indices = @transform_3, window_bounds = array<i64: 1, 8, 128>}, {transform_indices = @transform_4, window_bounds = array<i64: 1, 1, 128>}, {transform_indices = @transform_5, window_bounds = array<i64: 1, 1, 128>}]} {
    %c0_i32 = arith.constant 0 : i32
    %0 = arith.cmpi eq, %arg1, %c0_i32 : i32
    %1 = arith.extui %0 : i1 to i32
    %c0_i32_0 = arith.constant 0 : i32
    %2 = arith.cmpi ne, %1, %c0_i32_0 : i32
    scf.if %2 {
      %cst_30 = arith.constant 0.000000e+00 : f32
      %41 = vector.broadcast %cst_30 : f32 to vector<1x128xf32>
      %c0_31 = arith.constant 0 : index
      %c0_32 = arith.constant 0 : index
      %c0_33 = arith.constant 0 : index
      %42 = vector.load %arg6[%c0_31, %c0_32, %c0_33] : memref<1x1x128xf32, #tpu.memory_space<vmem>>, vector<1x1x128xf32>
      %43 = vector.shape_cast %42 : vector<1x1x128xf32> to vector<1x128xf32>
      %44 = vector.shape_cast %41 : vector<1x128xf32> to vector<1x1x128xf32>
      tpu.vector_store %arg6[%c0_31, %c0_32, %c0_33], %44 {strides = array<i32>} : memref<1x1x128xf32, #tpu.memory_space<vmem>>, vector<1x1x128xf32>,
      %cst_34 = arith.constant 0.000000e+00 : f32
      %45 = vector.broadcast %cst_34 : f32 to vector<1x128xf32>
      %c0_35 = arith.constant 0 : index
      %c0_36 = arith.constant 0 : index
      %c0_37 = arith.constant 0 : index
      %46 = vector.load %arg7[%c0_35, %c0_36, %c0_37] : memref<1x1x128xf32, #tpu.memory_space<vmem>>, vector<1x1x128xf32>
      %47 = vector.shape_cast %46 : vector<1x1x128xf32> to vector<1x128xf32>
      %48 = vector.shape_cast %45 : vector<1x128xf32> to vector<1x1x128xf32>
      tpu.vector_store %arg7[%c0_35, %c0_36, %c0_37], %48 {strides = array<i32>} : memref<1x1x128xf32, #tpu.memory_space<vmem>>, vector<1x1x128xf32>,
    } else {
    }
    %c0 = arith.constant 0 : index
    %c0_1 = arith.constant 0 : index
    %c0_2 = arith.constant 0 : index
    %3 = vector.load %arg2[%c0, %c0_1, %c0_2] : memref<1x8x128xf32, #tpu.memory_space<vmem>>, vector<1x8x128xf32>
    %4 = vector.shape_cast %3 : vector<1x8x128xf32> to vector<8x128xf32>
    %c0_3 = arith.constant 0 : index
    %c0_4 = arith.constant 0 : index
    %c0_5 = arith.constant 0 : index
    %5 = vector.load %arg3[%c0_3, %c0_4, %c0_5] : memref<1x8x128xf32, #tpu.memory_space<vmem>>, vector<1x8x128xf32>
    %6 = vector.shape_cast %5 : vector<1x8x128xf32> to vector<8x128xf32>
    %c0_6 = arith.constant 0 : index
    %c0_7 = arith.constant 0 : index
    %c0_8 = arith.constant 0 : index
    %7 = vector.load %arg4[%c0_6, %c0_7, %c0_8] : memref<1x8x128xf32, #tpu.memory_space<vmem>>, vector<1x8x128xf32>
    %8 = vector.shape_cast %7 : vector<1x8x128xf32> to vector<8x128xf32>
    %9 = arith.subf %6, %4 : vector<8x128xf32>
    %10 = arith.mulf %9, %9 : vector<8x128xf32>
    %cst = arith.constant 0.000000e+00 : f32
    %11 = vector.broadcast %cst : f32 to vector<8x128xf32>
    %12 = arith.cmpf ogt, %8, %11 : vector<8x128xf32>
    %cst_9 = arith.constant 0.000000e+00 : f32
    %13 = vector.broadcast %cst_9 : f32 to vector<8x128xf32>
    %14 = arith.cmpf ogt, %6, %13 : vector<8x128xf32>
    %cst_10 = arith.constant dense<true> : vector<8x128xi1>
    %15 = arith.xori %12, %cst_10 : vector<8x128xi1>
    %16 = arith.andi %14, %15 : vector<8x128xi1>
    %cst_11 = arith.constant 0.000000e+00 : f32
    %17 = vector.broadcast %cst_11 : f32 to vector<8x128xf32>
    %18 = arith.select %16, %10, %17 : vector<8x128xi1>, vector<8x128xf32>
    %c0_12 = arith.constant 0 : index
    %c0_13 = arith.constant 0 : index
    %c0_14 = arith.constant 0 : index
    %19 = vector.load %arg5[%c0_12, %c0_13, %c0_14] : memref<1x8x128xf32, #tpu.memory_space<vmem>>, vector<1x8x128xf32>
    %20 = vector.shape_cast %19 : vector<1x8x128xf32> to vector<8x128xf32>
    %21 = vector.shape_cast %18 : vector<8x128xf32> to vector<1x8x128xf32>
    tpu.vector_store %arg5[%c0_12, %c0_13, %c0_14], %21 {strides = array<i32>} : memref<1x8x128xf32, #tpu.memory_space<vmem>>, vector<1x8x128xf32>,
    %22 = arith.mulf %8, %10 : vector<8x128xf32>
    %cst_15 = arith.constant 0.000000e+00 : f32
    %23 = vector.broadcast %cst_15 : f32 to vector<8x128xf32>
    %24 = arith.select %12, %22, %23 : vector<8x128xi1>, vector<8x128xf32>
    %c0_16 = arith.constant 0 : index
    %c0_17 = arith.constant 0 : index
    %c0_18 = arith.constant 0 : index
    %25 = vector.load %arg6[%c0_16, %c0_17, %c0_18] : memref<1x1x128xf32, #tpu.memory_space<vmem>>, vector<1x1x128xf32>
    %26 = vector.shape_cast %25 : vector<1x1x128xf32> to vector<1x128xf32>
    %cst_19 = arith.constant dense<0.000000e+00> : vector<128xf32>
    %27 = vector.multi_reduction <add>, %24, %cst_19 [0] : vector<8x128xf32> to vector<128xf32>
    %28 = vector.shape_cast %27 : vector<128xf32> to vector<1x128xf32>
    %29 = arith.addf %26, %28 : vector<1x128xf32>
    %c0_20 = arith.constant 0 : index
    %c0_21 = arith.constant 0 : index
    %c0_22 = arith.constant 0 : index
    %30 = vector.load %arg6[%c0_20, %c0_21, %c0_22] : memref<1x1x128xf32, #tpu.memory_space<vmem>>, vector<1x1x128xf32>
    %31 = vector.shape_cast %30 : vector<1x1x128xf32> to vector<1x128xf32>
    %32 = vector.shape_cast %29 : vector<1x128xf32> to vector<1x1x128xf32>
    tpu.vector_store %arg6[%c0_20, %c0_21, %c0_22], %32 {strides = array<i32>} : memref<1x1x128xf32, #tpu.memory_space<vmem>>, vector<1x1x128xf32>,
    %c0_23 = arith.constant 0 : index
    %c0_24 = arith.constant 0 : index
    %c0_25 = arith.constant 0 : index
    %33 = vector.load %arg7[%c0_23, %c0_24, %c0_25] : memref<1x1x128xf32, #tpu.memory_space<vmem>>, vector<1x1x128xf32>
    %34 = vector.shape_cast %33 : vector<1x1x128xf32> to vector<1x128xf32>
    %cst_26 = arith.constant dense<0.000000e+00> : vector<128xf32>
    %35 = vector.multi_reduction <add>, %10, %cst_26 [0] : vector<8x128xf32> to vector<128xf32>
    %36 = vector.shape_cast %35 : vector<128xf32> to vector<1x128xf32>
    %37 = arith.addf %34, %36 : vector<1x128xf32>
    %c0_27 = arith.constant 0 : index
    %c0_28 = arith.constant 0 : index
    %c0_29 = arith.constant 0 : index
    %38 = vector.load %arg7[%c0_27, %c0_28, %c0_29] : memref<1x1x128xf32, #tpu.memory_space<vmem>>, vector<1x1x128xf32>
    %39 = vector.shape_cast %38 : vector<1x1x128xf32> to vector<1x128xf32>
    %40 = vector.shape_cast %37 : vector<1x128xf32> to vector<1x1x128xf32>
    tpu.vector_store %arg7[%c0_27, %c0_28, %c0_29], %40 {strides = array<i32>} : memref<1x1x128xf32, #tpu.memory_space<vmem>>, vector<1x1x128xf32>,
    return
  }
  func.func @transform_0(%arg0: i32, %arg1: i32) -> (i32, i32, i32) {
    %c0_i32 = arith.constant 0 : i32
    %c0_i32_0 = arith.constant 0 : i32
    return %arg0, %arg1, %c0_i32 : i32, i32, i32
  }
  func.func @transform_1(%arg0: i32, %arg1: i32) -> (i32, i32, i32) {
    %c0_i32 = arith.constant 0 : i32
    %c0_i32_0 = arith.constant 0 : i32
    return %arg0, %arg1, %c0_i32 : i32, i32, i32
  }
  func.func @transform_2(%arg0: i32, %arg1: i32) -> (i32, i32, i32) {
    %c0_i32 = arith.constant 0 : i32
    %c0_i32_0 = arith.constant 0 : i32
    return %arg0, %arg1, %c0_i32 : i32, i32, i32
  }
  func.func @transform_3(%arg0: i32, %arg1: i32) -> (i32, i32, i32) {
    %c0_i32 = arith.constant 0 : i32
    %c0_i32_0 = arith.constant 0 : i32
    return %arg0, %arg1, %c0_i32 : i32, i32, i32
  }
  func.func @transform_4(%arg0: i32, %arg1: i32) -> (i32, i32, i32) {
    %c0_i32 = arith.constant 0 : i32
    %c0_i32_0 = arith.constant 0 : i32
    %c0_i32_1 = arith.constant 0 : i32
    return %arg0, %c0_i32, %c0_i32_0 : i32, i32, i32
  }
  func.func @transform_5(%arg0: i32, %arg1: i32) -> (i32, i32, i32) {
    %c0_i32 = arith.constant 0 : i32
    %c0_i32_0 = arith.constant 0 : i32
    %c0_i32_1 = arith.constant 0 : i32
    return %arg0, %c0_i32, %c0_i32_0 : i32, i32, i32
  }
}

</mosaic_0001>

<bundles_post_ra>
// kernel: tpu_custom_call.1
= control target key start
LH: loop header
LB: loop body
LE: loop exit
PB: predicated region body
PF: predicated region fallthrough
CT: control target
= control target key end

     0   :  { %s1216_s0 = inlined_call_operand.hbm [shape: f32[2,8,128], index: 0, kind: input, shape index: {}]   ;;  %s1217_s1 = inlined_call_operand.hbm [shape: f32[2,8,128], index: 1, kind: input, shape index: {}]   ;;  %s1218_s2 = inlined_call_operand.hbm [shape: f32[2,8,128], index: 2, kind: input, shape index: {}]   ;;  %s1219_s3 = inlined_call_operand.hbm [shape: f32[2,8,128], index: 3, kind: output, shape index: {0}]   ;;  %s1220_s4 = inlined_call_operand.hbm [shape: f32[2,1,128], index: 4, kind: output, shape index: {1}]   ;;  %s1221_s5 = inlined_call_operand.hbm [shape: f32[2,1,128], index: 5, kind: output, shape index: {2}]  }
   0x1   :  { %1228 = sst [smem:[#allocation21_spill]] %s1217_s1 }
   0x2   :  { %11 = vsyncpa [#allocation3], 0 }
   0x3   :  { %13 = vsyncpa [#allocation3 + $0x1], 0 }
   0x4   :  { %14 = vsyncpa [#allocation6], 0 }
   0x5   :  { %16 = vsyncpa [#allocation6 + $0x1], 0 }
   0x6   :  { %17 = vsyncpa [#allocation4], 0 }
   0x7   :  { %19 = vsyncpa [#allocation4 + $0x1], 0 }
   0x8   :  { %20 = vsyncpa [#allocation10], 0 }
   0x9   :  { %22 = vsyncpa [#allocation10 + $0x1], 0  ;;  %s995_s18 = smov 0   ;;  %s997_s19 = smov 0  }
   0xa   :  { %s999_s20 = smov 0   ;;  %s1001_s21 = smov 0  }
   0xb   :  { %s1003_s22 = smov 0   ;;  %s1005_s23 = smov 0  }
   0xc LB: > { %1229 = sst [smem:[#allocation16_spill]] %s949_s20  ;;  %s1026_s24 = sadd.s32 4294967295, %s961_s23   ;;  %s961_s23 = sphi %s1005_s23, %s28_s23   ;;  %s957_s22 = sphi %s1003_s22, %s1246_s22   ;;  %s953_s21 = sphi %s1001_s21, %s1245_s21   ;;  %s949_s20 = sphi %s999_s20, %s1244_s20   ;;  %s945_s19 = sphi %s997_s19, %s1248_s19   ;;  %s941_s18 = sphi %s995_s18, %s1247_s18  }
   0xd   : > { %1230 = sst [smem:[#allocation17_spill]] %s957_s22  ;;  %s1222_s25 = sadd.s32 4294967294, %s961_s23  }
   0xe   : > { %1231 = sst [smem:[#allocation18_spill]] %s961_s23  ;;  %s40_s26 = sadd.s32 1, %s957_s22 }
   0xf   : > { %s49_s27 = sadd.s32 1, %s949_s20  ;;  %p42_p0 = scmp.ge.s32.totalorder %s40_s26, 2 }
  0x10   : > { %p56_p1 = scmp.ne.s32.totalorder %s949_s20, %s945_s19  ;;  %p57_p2 = scmp.eq.s32.totalorder %s961_s23, 0 }
  0x11   : > { %p62_p3 = scmp.ne.s32.totalorder %s945_s19, %s941_s18  ;;  %s1250_s26 = smov (%p42_p0, %s40_s26), 0 }
  0x12   : > { %1232 = sst [smem:[#allocation19_spill]] %s1250_s26  ;;  %p1038_p4 = por %p57_p2, %p56_p1 }
  0x13   : > { %p63_p5 = scmp.eq.s32.totalorder %s1026_s24, 0  ;;  %s44_s29 = ssub.s32 %s957_s22, %s1250_s26 }
  0x14   : > { %p144_p6 = scmp.eq.s32.totalorder %s1026_s24, 1  ;;  %p47_p7 = scmp.eq.s32.totalorder %s44_s29, 0 }
  0x15   : > { %p1046_p8 = por %p63_p5, %p62_p3  ;;  %p150_p10 = scmp.eq.s32.totalorder %s1222_s25, 1 }
  0x16   : > { %p1050_p9 = por %p144_p6, %p56_p1  ;;  %p625_p12 = scmp.ge.s32.totalorder %s961_s23, 2 }
  0x17   : > { %s1057_s7 = scalar_select %p47_p7, %s949_s20, %s49_s27  }
  0x18   : > { %p1059_p11 = por %p150_p10, %p62_p3  ;;  %p673_p13 = scmp.lt.s32.totalorder %s961_s23, 2 }
  0x19   : > { %1236 = sst [smem:[#allocation20_spill]] %s1057_s7  ;;  %s222_s9 = sand.u32 1, %s949_s20  }
  0x1a   : > { %s626_s10 = sshll.u32 %s222_s9, 3  ;;  %s627_s11 = sshll.u32 %s957_s22, 3 }
  0x1b   : > { %p1069_p0 = pnand %p673_p13, %p1038_p4  ;;  %s242_s13 = sand.u32 1, %s961_s23  }
  0x1c   : > { %s1239_s1 = sld [smem:[#allocation21_spill]]  ;;  %s246_s27 = scalar_lea.vmem [#allocation5], %s626_s10 }
  0x1d   : > { %s255_s29 = sshll.u32 %s246_s27, 4  ;;  %s243_s25 = scalar_lea.sflag [#allocation6], %s242_s13  ;;  %s256_s29 = int_to_ptr.vmem [resolvable:$true] %s255_s29 }
  0x1e   : > { %p632_p1 = scmp.ge.s32.totalorder %s961_s23, 1  ;;  %p280_p2 = scmp.lt.s32.totalorder %s961_s23, 3 }
  0x1f   : > { %s231_s14 = scalar_lea.hbm %s1216_s0, %s627_s11  ;;  %s223_s27 = scalar_lea.sflag [#allocation3], %s222_s9 }
  0x20   : > { %p1081_p3 = pnand %p632_p1, %p280_p2  ;;  %s233_s15 = sshll.u32 %s231_s14, 4  ;;  %s234_s15 = int_to_ptr.hbm [resolvable:$true] %s233_s15 }
  0x21   : > { %s266_s20 = scalar_lea.vmem [#allocation7], %s626_s10  ;;  %s1098_s22 = sand.u32 (!%p1081_p3), 1, %s945_s19  }
  0x22   : > { %s251_s16 = scalar_lea.hbm %s1239_s1, %s627_s11  ;;  %s275_s23 = sshll.u32 %s266_s20, 4  ;;  %s276_s23 = int_to_ptr.vmem [resolvable:$true] %s275_s23 }
  0x23   : > { %s253_s17 = sshll.u32 %s251_s16, 4  ;;  %s226_s16 = scalar_lea.vmem [#allocation2], %s626_s10  ;;  %s254_s17 = int_to_ptr.hbm [resolvable:$true] %s253_s17 }
  0x24   : > { %659 = dma.hbm_to_vmem [thread:$0]  (!%p1069_p0), %s254_s17, 128, %s256_s29, %s243_s25  }
  0x25   : > { %s235_s1 = sshll.u32 %s226_s16, 4  ;;  %s271_s29 = scalar_lea.hbm %s1218_s2, %s627_s11  ;;  %s236_s1 = int_to_ptr.vmem [resolvable:$true] %s235_s1 }
  0x26   : > { %656 = dma.hbm_to_vmem [thread:$0]  (!%p1069_p0), %s234_s15, 128, %s236_s1, %s223_s27  }
  0x27   : > { %s273_s7 = sshll.u32 %s271_s29, 4  ;;  %284 = sbr.rel (%p1081_p3) target bundleno = 95 (0x5f), region = 32  ;;  %s274_s7 = int_to_ptr.hbm [resolvable:$true] %s273_s7 }
  0x28   : > { %662 = dma.hbm_to_vmem [thread:$0]  (!%p1069_p0), %s274_s7, 128, %s276_s23, %s243_s25  }
  0x29   : > { %s1101_s1 = sshll.u32 (!%p1081_p3), %s1098_s22, 3  ;;  %s287_s26 = scalar_lea.sflag (!%p1081_p3), [#allocation3], %s1098_s22 }
  0x2a   : > { %s290_s9 = scalar_lea.vmem (!%p1081_p3), [#allocation2], %s1101_s1 }
  0x2c   : > { %924 = dma.done.wait (%p1046_p8), %s287_s26, 128  }
  0x2d   : > { %926 = vsyncadd (%p1046_p8), %s287_s26, 4294967168  ;;  %s296_s20 = sand.u32 1, %s1026_s24   ;;  %s300_s25 = scalar_lea.vmem [#allocation5], %s1101_s1 }
  0x2e   : > { %s297_s23 = scalar_lea.sflag [#allocation6], %s296_s20 }
  0x2f   : > { %928 = dma.done.wait (%p1046_p8), %s297_s23, 256  }
  0x30   : > { %930 = vsyncadd (%p1046_p8), %s297_s23, 4294967040  ;;  %s1118_s7 = scalar_lea.vmem [#allocation9], %s1098_s22  ;;  %v963_v0 = vmov 0.0   ;;  %s1122_s10 = scalar_lea.vmem [#allocation11], %s1098_s22  ;;  %v362_v1 = vld [vmem:[%s290_s9] sm:$0xff]  ;;  %v363_v2 = vld [vmem:[%s300_s25] sm:$0xff] }
  0x31   : > { %360 = vst [vmem:[%s1118_s7] sm:$0x1] %v963_v0  ;;  %s310_s11 = scalar_lea.vmem [#allocation7], %s1101_s1  ;;  %s343_s30 = scalar_lea.vmem [#allocation8], %s1101_s1  ;;  %v365_v4 = vsub.f32 %v363_v2, %v362_v1  ;;  %vm368_vm1 = vcmp.gt.f32.partialorder %v363_v2, 0.0  ;;  %vm964_vm2 = vmmov 1  }
  0x32   : > { %361 = vst [vmem:[%s1122_s10] sm:$0x1] %v963_v0  ;;  %v364_v3 = vld [vmem:[%s310_s11] sm:$0xff]  ;;  %s1127_s12 = sshll.u32 %s343_s30, 4  ;;  %s638_s28 = sshll.u32 %s953_s21, 3  ;;  %s416_s12 = int_to_ptr.vmem [resolvable:$true] %s1127_s12 }
  0x33   : > { %vm367_vm0 = vcmp.gt.f32.partialorder %v364_v3, 0.0  ;;  %s413_s16 = scalar_lea.hbm %s1219_s3, %s638_s28  ;;  %v366_v5 = vmul.f32 %v365_v4, %v365_v4  ;;  %s394_s13 = scalar_lea.sflag [#allocation4], %s1098_s22 }
  0x34   : > { %vm369_vm3 = vmxor %vm367_vm0, %vm964_vm2  ;;  %s417_s27 = sshll.u32 %s413_s16, 4  ;;  %s835_s9 = scalar_lea.hbm %s1219_s3, 16  ;;  %s418_s27 = int_to_ptr.hbm [resolvable:$true] %s417_s27 }
  0x35   : > { %vm370_vm4 = vmand %vm368_vm1, %vm369_vm3  ;;  %v373_v6 = vmul.f32 %v366_v5, %v364_v3  ;;  %v385_v8 = vrot.slane %v366_v5, 4  ;;  %s829_s17 = sshra.s32 %s418_s27, 4  ;;  %s830_s17 = int_to_ptr.hbm [resolvable:$true] %s829_s17 }
  0x36   : > { %v371_v7 = vsel %vm370_vm4, %v366_v5, 0.0  ;;  %s831_s29 = scalar_lea.hbm %s830_s17, 8  ;;  %p836_p7 = scmp.lt.s32.totalorder %s830_s17, %s1219_s3 }
  0x37   : > { %372 = vst [vmem:[%s343_s30] sm:$0xff] %v371_v7  ;;  %v374_v9 = vsel %vm367_vm0, %v373_v6, 0.0  ;;  %v386_v10 = vadd.f32 %v385_v8, %v366_v5  ;;  %p832_p4 = scmp.ne.s32.totalorder %s830_s17, %s831_s29  ;;  %p837_p8 = scmp.lt.s32.totalorder %s835_s9, %s831_s29 }
  0x39   : > { %p833_p5 = pnand %p832_p4, %p1050_p9  ;;  %p838_p10 = por %p837_p8, %p836_p7 }
  0x3b   : > { %p834_p6 = pneg %p833_p5 }
  0x3d   : > { %p839_p13 = pnand %p838_p10, %p834_p6 }
  0x3f   : > { %842 = shalt.err (!%p839_p13)
}
  0x40   : > { %647 = dma.vmem_to_hbm [thread:$0]  (%p1050_p9), %s416_s12, 128, %s418_s27, %s394_s13   ;;  %v376_v11 = vrot.slane %v374_v9, 4  ;;  %v387_v12 = vrot.slane %v386_v10, 2  ;;  %v384_v18 = vld [vmem:[%s1122_s10] sm:$0x1] }
  0x41   : > { %s426_s30 = scalar_lea.hbm %s1220_s4, %s953_s21  ;;  %s439_s12 = scalar_lea.hbm %s1221_s5, %s953_s21  ;;  %v375_v21 = vld [vmem:[%s1118_s7] sm:$0x1] }
  0x42   : > { %v377_v13 = vadd.f32 %v376_v11, %v374_v9  ;;  %v388_v14 = vadd.f32 %v387_v12, %v386_v10  ;;  %s428_s15 = sshll.u32 %s1118_s7, 4  ;;  %s430_s16 = sshll.u32 %s426_s30, 4  ;;  %s429_s15 = int_to_ptr.vmem [resolvable:$true] %s428_s15  ;;  %s431_s16 = int_to_ptr.hbm [resolvable:$true] %s430_s16 }
  0x43   : > { %s441_s27 = sshll.u32 %s1122_s10, 4  ;;  %s1157_s13 = sshll.u32 %s439_s12, 4  ;;  %s1160_s27 = int_to_ptr.vmem [resolvable:$true] %s441_s27  ;;  %s444_s13 = int_to_ptr.hbm [resolvable:$true] %s1157_s13 }
  0x44   : > { %v378_v15 = vrot.slane %v377_v13, 2  ;;  %v389_v16 = vrot.slane %v388_v14, 1  ;;  %s399_s21 = scalar_lea.sflag [#allocation10], %s296_s20  ;;  %s857_s17 = sshra.s32 %s431_s16, 4  ;;  %s858_s17 = int_to_ptr.hbm [resolvable:$true] %s857_s17 }
  0x45   : > { %s859_s29 = scalar_lea.hbm %s858_s17, 1  ;;  %p864_p3 = scmp.lt.s32.totalorder %s858_s17, %s1220_s4 }
  0x46   : > { %v379_v17 = vadd.f32 %v378_v15, %v377_v13  ;;  %v390_v19 = vadd.f32 %v389_v16, %v388_v14  ;;  %p860_p0 = scmp.ne.s32.totalorder %s858_s17, %s859_s29 }
  0x48   : > { %v380_v20 = vrot.slane %v379_v17, 1  ;;  %v391_v22 = vadd.f32 %v390_v19, %v384_v18  ;;  %p861_p1 = pnand %p860_p0, %p1050_p9 }
  0x4a   : > { %v381_v23 = vadd.f32 %v380_v20, %v379_v17  ;;  %392 = vst [vmem:[%s1122_s10] sm:$0x1] %v391_v22  ;;  %p862_p2 = pneg %p861_p1  ;;  %s863_s10 = scalar_lea.hbm %s1220_s4, 2 }
  0x4b   : > { %p865_p4 = scmp.lt.s32.totalorder %s863_s10, %s859_s29 }
  0x4c   : > { %v382_v24 = vadd.f32 %v381_v23, %v375_v21 }
  0x4d   : > { %p866_p5 = por %p865_p4, %p864_p3 }
  0x4e   : > { %383 = vst [vmem:[%s1118_s7] sm:$0x1] %v382_v24 }
  0x4f   : > { %p867_p6 = pnand %p866_p5, %p862_p2 }
  0x51   : > { %870 = shalt.err (!%p867_p6)
}
  0x52   : > { %648 = dma.vmem_to_hbm [thread:$0]  (%p1050_p9), %s429_s15, 16, %s431_s16, %s399_s21  }
  0x53   : > { %s885_s24 = sshra.s32 %s444_s13, 4  ;;  %s891_s22 = scalar_lea.hbm %s1221_s5, 2  ;;  %s886_s24 = int_to_ptr.hbm [resolvable:$true] %s885_s24 }
  0x54   : > { %s887_s20 = scalar_lea.hbm %s886_s24, 1  ;;  %p892_p13 = scmp.lt.s32.totalorder %s886_s24, %s1221_s5 }
  0x55   : > { %p888_p7 = scmp.ne.s32.totalorder %s886_s24, %s887_s20  ;;  %p893_p0 = scmp.lt.s32.totalorder %s891_s22, %s887_s20 }
  0x57   : > { %p889_p8 = pnand %p888_p7, %p1050_p9  ;;  %p894_p1 = por %p893_p0, %p892_p13 }
  0x59   : > { %p890_p10 = pneg %p889_p8 }
  0x5b   : > { %p895_p2 = pnand %p894_p1, %p890_p10 }
  0x5d   : > { %898 = shalt.err (!%p895_p2)
}
  0x5e   : > { %649 = dma.vmem_to_hbm [thread:$0]  (%p1050_p9), %s1160_s27, 16, %s444_s13, %s399_s21  }
  0x5f PF: > { %s1241_s28 = sld [smem:[#allocation18_spill]]  ;;  %s455_s14 = sand.u32 1, %s941_s18  }
  0x60   : > { %p664_p3 = pnand %p625_p12, %p1059_p11  ;;  %s456_s12 = scalar_lea.sflag [#allocation4], %s455_s14 }
  0x62   : > { %p665_p4 = pneg %p664_p3 }
  0x64   : > { %932 = dma.done.wait (%p665_p4), %s456_s12, 128  }
  0x65   : > { %934 = vsyncadd (%p665_p4), %s456_s12, 4294967168  ;;  %s1242_s15 = sadd.s32 4294967294, %s1241_s28  }
  0x66   : > { %s465_s16 = sand.u32 1, %s1242_s15  }
  0x67   : > { %s466_s6 = scalar_lea.sflag [#allocation10], %s465_s16 }
  0x68   : > { %936 = dma.done.wait (%p665_p4), %s466_s6, 32  }
  0x69   : > { %938 = vsyncadd (%p665_p4), %s466_s6, 4294967264  ;;  %s28_s23 = sadd.s32 1, %s1241_s28   ;;  %s1243_s27 = sld [smem:[#allocation16_spill]] }
  0x6a   : > { %p25_p9 = scmp.ge.s32.totalorder %s28_s23, 4   ;;  %s1244_s20 = sld [smem:[#allocation20_spill]] }
  0x6b   : > { %s1245_s21 = sld [smem:[#allocation17_spill]]  ;;  %s1247_s18 = smov %s945_s19 }
  0x6c   : > { %s1246_s22 = sld [smem:[#allocation19_spill]]  ;;  %27 = sbr.rel (!%p25_p9) target bundleno = 12 (0xc), region = 137 }
  0x6f   : > { %s1248_s19 = smov %s1243_s27 }
  0x71   :  { %480 = vsyncpa [#allocation3], 1 }
  0x72   :  { %482 = vsyncpa [#allocation3 + $0x1], 1 }
  0x73   :  { %483 = vsyncpa [#allocation6], 1 }
  0x74   :  { %485 = vsyncpa [#allocation6 + $0x1], 1 }
  0x75   :  { %486 = vsyncpa [#allocation4], 1 }
  0x76   :  { %488 = vsyncpa [#allocation4 + $0x1], 1 }
  0x77   :  { %489 = vsyncpa [#allocation10], 1 }
  0x78   :  { %491 = vsyncpa [#allocation10 + $0x1], 1 }

</bundles_post_ra>
